<compile_context>
chip_gen: v6e
topology: v6e:2x2x1
jax: 0.10.0
libtpu: 0.0.40
codegen_flags: <defaults>
</compile_context>

<pallas_src>
import numpy as np
import jax
import jax.numpy as jnp
from jax.experimental import pallas as pl
from jax.experimental.pallas import tpu as pltpu

# ----- problem sizes (small, consistent with the module) -----
B = 2             # batch
S = 8             # sequence length
D_MODEL = 32      # d_model
H = 4             # num_heads
DK = D_MODEL // H # d_k == d_v == 8
N = B * S         # flattened tokens

NEG_BIG = -1e30   # finite "minus infinity": no NaN even if a row were fully masked


def mha_kernel(x_ref, wqkv_ref, wo_ref, mask_ref, o_ref):
    # x_ref:    (N, D_MODEL)       bf16   flattened (B*S, D) activations
    # wqkv_ref: (D_MODEL, 3*H*DK)  bf16   [W_Q^T/sqrt(dk) | W_K^T | W_V^T], head-major cols
    # wo_ref:   (H*DK, D_MODEL)    bf16   W_O^T
    # mask_ref: (N, N)             f32    additive block-diag causal mask (0 / -1e30)
    # o_ref:    (N, D_MODEL)       f32
    x = x_ref[...]

    # Fused QKV projection: ONE lane-dense (N,32)@(32,96) MXU matmul, f32 acc.
    qkv = jnp.dot(x, wqkv_ref[...], preferred_element_type=jnp.float32)   # (N, 96)
    qkv_b = qkv.astype(jnp.bfloat16)   # bf16 only for matmul operands

    mask_add = mask_ref[...]                                              # (N, N) f32

    # Per-head attention.  H is tiny & static; the score / PV matmuls are
    # inherently per-head on the MXU (a batched 3-D einsum loops over h
    # internally anyway), so a static unrolled loop over lane slices avoids
    # any 3-D reshape/transpose relayouts inside the kernel.
    pieces = []
    for h in range(H):
        q_h = qkv_b[:, h * DK:(h + 1) * DK]                               # (N, DK), pre-scaled
        k_h = qkv_b[:, H * DK + h * DK: H * DK + (h + 1) * DK]            # (N, DK)
        v_h = qkv_b[:, 2 * H * DK + h * DK: 2 * H * DK + (h + 1) * DK]    # (N, DK)

        s = jnp.einsum('qd,kd->qk', q_h, k_h,
                       preferred_element_type=jnp.float32)                # (N, N) f32
        s = s + mask_add                                                  # static mask

        # numerically stable softmax numerator (f32 on VPU/EUP)
        m = jnp.max(s, axis=-1, keepdims=True)                            # (N, 1)
        e = jnp.exp(s - m)                                                # (N, N)
        denom = jnp.sum(e, axis=-1, keepdims=True)                        # (N, 1)

        # Deferred normalization: PV on the UNnormalized numerator, then one
        # small (N, DK) scale by 1/denom on the EUP (not a VALU divide over NxN).
        pv = jnp.dot(e.astype(jnp.bfloat16), v_h,
                     preferred_element_type=jnp.float32)                  # (N, DK) f32
        pieces.append(pv * pl.reciprocal(denom, approx=True))

    # Concatenate heads along lanes -> (N, H*DK), then ONE output-projection
    # matmul (fuses the per-head projection and the cross-head sum).
    attn_concat = jnp.concatenate(pieces, axis=1)                         # (N, 32) f32
    out = jnp.dot(attn_concat.astype(jnp.bfloat16), wo_ref[...],
                  preferred_element_type=jnp.float32)                     # (N, D_MODEL)
    o_ref[...] = out.astype(o_ref.dtype)


def prepare_mha_params(w_q, w_k, w_v, w_o):
    """One-time weight/mask re-layout.  Cache the result: the per-call hot path
    only reshapes/casts x and launches the pallas_call."""
    inv_sqrt_dk = np.float32(1.0 / np.sqrt(DK))
    # (D_MODEL, 3*H*DK): [scaled Q | K | V], head-major column order within each block.
    wqkv = jnp.concatenate(
        [(w_q * inv_sqrt_dk).T, w_k.T, w_v.T], axis=1).astype(jnp.bfloat16)
    wo_t = jnp.transpose(w_o, (1, 0)).astype(jnp.bfloat16)                # (H*DK, D_MODEL)

    # Block-diagonal causal mask over the flattened (B*S) axis, built at trace
    # time with numpy: keep iff same batch AND key_pos <= query_pos.
    idx = np.arange(N)
    keep = (idx[:, None] // S == idx[None, :] // S) & (idx[None, :] <= idx[:, None])
    mask_add = jnp.asarray(np.where(keep, 0.0, NEG_BIG).astype(np.float32))  # (N, N)
    return wqkv, wo_t, mask_add


@jax.jit
def mha_forward(x, wqkv, wo_t, mask_add):
    b, s, d = x.shape
    x2d = x.reshape(b * s, d).astype(jnp.bfloat16)
    out2d = pl.pallas_call(
        mha_kernel,
        out_shape=jax.ShapeDtypeStruct((b * s, d), x.dtype),
        in_specs=[
            pl.BlockSpec(memory_space=pltpu.MemorySpace.VMEM),   # x   (B*S, D)
            pl.BlockSpec(memory_space=pltpu.MemorySpace.VMEM),   # fused QKV weights
            pl.BlockSpec(memory_space=pltpu.MemorySpace.VMEM),   # W_O^T
            pl.BlockSpec(memory_space=pltpu.MemorySpace.VMEM),   # additive mask
        ],
        out_specs=pl.BlockSpec(memory_space=pltpu.MemorySpace.VMEM),
    )(x2d, wqkv, wo_t, mask_add)
    return out2d.reshape(b, s, d)


def multihead_self_attention(x, w_q, w_k, w_v, w_o):
    # Convenience wrapper matching the module signature (prep NOT cached here;
    # use prepare_mha_params + mha_forward directly in a real hot loop).
    params = prepare_mha_params(w_q, w_k, w_v, w_o)
    return mha_forward(x, *params)


def reference_mha(x, w_q, w_k, w_v, w_o):
    # pure-JAX f32 reference mirroring the PyTorch forward
    q = jnp.einsum('hd,bsd->bsh', w_q, x)
    k = jnp.einsum('hd,bsd->bsh', w_k, x)
    v = jnp.einsum('hd,bsd->bsh', w_v, x)

    def split(t):
        b, s, _ = t.shape
        return t.reshape(b, s, H, DK).transpose(0, 2, 1, 3)   # (b, H, s, dk)

    q, k, v = split(q), split(k), split(v)
    scores = jnp.einsum('bhqd,bhkd->bhqk', q, k) / np.sqrt(DK)
    mask = ~jnp.triu(jnp.ones((S, S), dtype=bool), k=1)
    scores = scores + jnp.where(mask, 0.0, -jnp.inf)
    p = jax.nn.softmax(scores, axis=-1)
    attn = jnp.einsum('bhqk,bhkd->bhqd', p, v)                # (b, H, s, dv)
    attn_concat = attn.transpose(0, 2, 1, 3).reshape(x.shape[0], S, H * DK)
    return jnp.einsum('dm,bsm->bsd', w_o, attn_concat)


if __name__ == "__main__":
    key = jax.random.PRNGKey(0)
    kx, kq, kk, kv, ko = jax.random.split(key, 5)

    std = np.sqrt(2.0 / (DK * H + D_MODEL))
    # deterministic trunc_normal(mean=0, std=1, a=-3, b=3) * std, matching __init__
    w_q = (jax.random.truncated_normal(kq, -3.0, 3.0, (H * DK, D_MODEL)) * std).astype(jnp.float32)
    w_k = (jax.random.truncated_normal(kk, -3.0, 3.0, (H * DK, D_MODEL)) * std).astype(jnp.float32)
    w_v = (jax.random.truncated_normal(kv, -3.0, 3.0, (H * DK, D_MODEL)) * std).astype(jnp.float32)
    w_o = (jax.random.truncated_normal(ko, -3.0, 3.0, (D_MODEL, H * DK)) * std).astype(jnp.float32)

    x = jax.random.normal(kx, (B, S, D_MODEL), dtype=jnp.float32)

    # One-time weight/mask prep (review item: hoisted out of the per-call path).
    wqkv, wo_t, mask_add = prepare_mha_params(w_q, w_k, w_v, w_o)

    out = mha_forward(x, wqkv, wo_t, mask_add)
    out = jax.block_until_ready(out)

    ref = reference_mha(x, w_q, w_k, w_v, w_o)
    # Tolerances loosened for bf16 MXU operands (f32 accumulation, f32 softmax,
    # approx reciprocal on the softmax denominator).
    np.testing.assert_allclose(np.asarray(out), np.asarray(ref), rtol=3e-2, atol=3e-2)

    print("KERNEL_OK")
</pallas_src>

<mosaic_0001>
module attributes {stable_mosaic.version = 11 : i64} {
  func.func @mha_kernel(%arg0: memref<16x32xbf16, #tpu.memory_space<vmem>>, %arg1: memref<32x96xbf16, #tpu.memory_space<vmem>>, %arg2: memref<32x32xbf16, #tpu.memory_space<vmem>>, %arg3: memref<16x16xf32, #tpu.memory_space<vmem>>, %arg4: memref<16x32xf32, #tpu.memory_space<vmem>>) attributes {dimension_semantics = [], scalar_prefetch = 0 : i64, scratch_operands = 0 : i64, tpu.core_type = #tpu.core_type<tc>} {
    %c0 = arith.constant 0 : index
    %c0_0 = arith.constant 0 : index
    %0 = vector.load %arg0[%c0, %c0_0] : memref<16x32xbf16, #tpu.memory_space<vmem>>, vector<16x32xbf16>
    %c0_1 = arith.constant 0 : index
    %c0_2 = arith.constant 0 : index
    %1 = vector.load %arg1[%c0_1, %c0_2] : memref<32x96xbf16, #tpu.memory_space<vmem>>, vector<32x96xbf16>
    %cst = arith.constant dense<0.000000e+00> : vector<16x96xf32>
    %2 = tpu.matmul %0, %1, %cst {dimension_numbers = #tpu.dot_dimension_numbers<[1], [0], [0], [1], [0, 0, 1, 1], [], []>} : vector<16x32xbf16>, vector<32x96xbf16>, vector<16x96xf32> -> vector<16x96xf32>
    %3 = arith.truncf %2 : vector<16x96xf32> to vector<16x96xbf16>
    %c0_3 = arith.constant 0 : index
    %c0_4 = arith.constant 0 : index
    %4 = vector.load %arg3[%c0_3, %c0_4] : memref<16x16xf32, #tpu.memory_space<vmem>>, vector<16x16xf32>
    %5 = vector.extract_strided_slice %3 {offsets = [0, 0], sizes = [16, 8], strides = [1, 1]} : vector<16x96xbf16> to vector<16x8xbf16>
    %6 = vector.extract_strided_slice %3 {offsets = [0, 32], sizes = [16, 8], strides = [1, 1]} : vector<16x96xbf16> to vector<16x8xbf16>
    %7 = vector.extract_strided_slice %3 {offsets = [0, 64], sizes = [16, 8], strides = [1, 1]} : vector<16x96xbf16> to vector<16x8xbf16>
    "tpu.trace_start"() <{level = 10 : i32, message = "qd,kd->qk"}> : () -> ()
    %cst_5 = arith.constant dense<0.000000e+00> : vector<16x16xf32>
    %8 = tpu.matmul %5, %6, %cst_5 {dimension_numbers = #tpu.dot_dimension_numbers<[1], [1], [0], [0], [0, 0, 1, 0], [], []>} : vector<16x8xbf16>, vector<16x8xbf16>, vector<16x16xf32> -> vector<16x16xf32>
    "tpu.trace_stop"() : () -> ()
    %9 = arith.addf %8, %4 : vector<16x16xf32>
    %cst_6 = arith.constant dense<0xFF800000> : vector<16xf32>
    %10 = vector.multi_reduction <maximumf>, %9, %cst_6 [1] : vector<16x16xf32> to vector<16xf32>
    %11 = vector.shape_cast %10 : vector<16xf32> to vector<16x1xf32>
    %12 = vector.broadcast %11 : vector<16x1xf32> to vector<16x16xf32>
    %13 = arith.subf %9, %12 : vector<16x16xf32>
    %14 = math.exp %13 : vector<16x16xf32>
    %cst_7 = arith.constant dense<0.000000e+00> : vector<16xf32>
    %15 = vector.multi_reduction <add>, %14, %cst_7 [1] : vector<16x16xf32> to vector<16xf32>
    %16 = vector.shape_cast %15 : vector<16xf32> to vector<16x1xf32>
    %17 = arith.truncf %14 : vector<16x16xf32> to vector<16x16xbf16>
    %cst_8 = arith.constant dense<0.000000e+00> : vector<16x8xf32>
    %18 = tpu.matmul %17, %7, %cst_8 {dimension_numbers = #tpu.dot_dimension_numbers<[1], [0], [0], [1], [0, 0, 1, 1], [], []>} : vector<16x16xbf16>, vector<16x8xbf16>, vector<16x8xf32> -> vector<16x8xf32>
    %19 = tpu.reciprocal %16 {approx = true} : vector<16x1xf32> -> vector<16x1xf32>
    %20 = vector.broadcast %19 : vector<16x1xf32> to vector<16x8xf32>
    %21 = arith.mulf %18, %20 : vector<16x8xf32>
    %22 = vector.extract_strided_slice %3 {offsets = [0, 8], sizes = [16, 8], strides = [1, 1]} : vector<16x96xbf16> to vector<16x8xbf16>
    %23 = vector.extract_strided_slice %3 {offsets = [0, 40], sizes = [16, 8], strides = [1, 1]} : vector<16x96xbf16> to vector<16x8xbf16>
    %24 = vector.extract_strided_slice %3 {offsets = [0, 72], sizes = [16, 8], strides = [1, 1]} : vector<16x96xbf16> to vector<16x8xbf16>
    "tpu.trace_start"() <{level = 10 : i32, message = "qd,kd->qk"}> : () -> ()
    %cst_9 = arith.constant dense<0.000000e+00> : vector<16x16xf32>
    %25 = tpu.matmul %22, %23, %cst_9 {dimension_numbers = #tpu.dot_dimension_numbers<[1], [1], [0], [0], [0, 0, 1, 0], [], []>} : vector<16x8xbf16>, vector<16x8xbf16>, vector<16x16xf32> -> vector<16x16xf32>
    "tpu.trace_stop"() : () -> ()
    %26 = arith.addf %25, %4 : vector<16x16xf32>
    %cst_10 = arith.constant dense<0xFF800000> : vector<16xf32>
    %27 = vector.multi_reduction <maximumf>, %26, %cst_10 [1] : vector<16x16xf32> to vector<16xf32>
    %28 = vector.shape_cast %27 : vector<16xf32> to vector<16x1xf32>
    %29 = vector.broadcast %28 : vector<16x1xf32> to vector<16x16xf32>
    %30 = arith.subf %26, %29 : vector<16x16xf32>
    %31 = math.exp %30 : vector<16x16xf32>
    %cst_11 = arith.constant dense<0.000000e+00> : vector<16xf32>
    %32 = vector.multi_reduction <add>, %31, %cst_11 [1] : vector<16x16xf32> to vector<16xf32>
    %33 = vector.shape_cast %32 : vector<16xf32> to vector<16x1xf32>
    %34 = arith.truncf %31 : vector<16x16xf32> to vector<16x16xbf16>
    %cst_12 = arith.constant dense<0.000000e+00> : vector<16x8xf32>
    %35 = tpu.matmul %34, %24, %cst_12 {dimension_numbers = #tpu.dot_dimension_numbers<[1], [0], [0], [1], [0, 0, 1, 1], [], []>} : vector<16x16xbf16>, vector<16x8xbf16>, vector<16x8xf32> -> vector<16x8xf32>
    %36 = tpu.reciprocal %33 {approx = true} : vector<16x1xf32> -> vector<16x1xf32>
    %37 = vector.broadcast %36 : vector<16x1xf32> to vector<16x8xf32>
    %38 = arith.mulf %35, %37 : vector<16x8xf32>
    %39 = vector.extract_strided_slice %3 {offsets = [0, 16], sizes = [16, 8], strides = [1, 1]} : vector<16x96xbf16> to vector<16x8xbf16>
    %40 = vector.extract_strided_slice %3 {offsets = [0, 48], sizes = [16, 8], strides = [1, 1]} : vector<16x96xbf16> to vector<16x8xbf16>
    %41 = vector.extract_strided_slice %3 {offsets = [0, 80], sizes = [16, 8], strides = [1, 1]} : vector<16x96xbf16> to vector<16x8xbf16>
    "tpu.trace_start"() <{level = 10 : i32, message = "qd,kd->qk"}> : () -> ()
    %cst_13 = arith.constant dense<0.000000e+00> : vector<16x16xf32>
    %42 = tpu.matmul %39, %40, %cst_13 {dimension_numbers = #tpu.dot_dimension_numbers<[1], [1], [0], [0], [0, 0, 1, 0], [], []>} : vector<16x8xbf16>, vector<16x8xbf16>, vector<16x16xf32> -> vector<16x16xf32>
    "tpu.trace_stop"() : () -> ()
    %43 = arith.addf %42, %4 : vector<16x16xf32>
    %cst_14 = arith.constant dense<0xFF800000> : vector<16xf32>
    %44 = vector.multi_reduction <maximumf>, %43, %cst_14 [1] : vector<16x16xf32> to vector<16xf32>
    %45 = vector.shape_cast %44 : vector<16xf32> to vector<16x1xf32>
    %46 = vector.broadcast %45 : vector<16x1xf32> to vector<16x16xf32>
    %47 = arith.subf %43, %46 : vector<16x16xf32>
    %48 = math.exp %47 : vector<16x16xf32>
    %cst_15 = arith.constant dense<0.000000e+00> : vector<16xf32>
    %49 = vector.multi_reduction <add>, %48, %cst_15 [1] : vector<16x16xf32> to vector<16xf32>
    %50 = vector.shape_cast %49 : vector<16xf32> to vector<16x1xf32>
    %51 = arith.truncf %48 : vector<16x16xf32> to vector<16x16xbf16>
    %cst_16 = arith.constant dense<0.000000e+00> : vector<16x8xf32>
    %52 = tpu.matmul %51, %41, %cst_16 {dimension_numbers = #tpu.dot_dimension_numbers<[1], [0], [0], [1], [0, 0, 1, 1], [], []>} : vector<16x16xbf16>, vector<16x8xbf16>, vector<16x8xf32> -> vector<16x8xf32>
    %53 = tpu.reciprocal %50 {approx = true} : vector<16x1xf32> -> vector<16x1xf32>
    %54 = vector.broadcast %53 : vector<16x1xf32> to vector<16x8xf32>
    %55 = arith.mulf %52, %54 : vector<16x8xf32>
    %56 = vector.extract_strided_slice %3 {offsets = [0, 24], sizes = [16, 8], strides = [1, 1]} : vector<16x96xbf16> to vector<16x8xbf16>
    %57 = vector.extract_strided_slice %3 {offsets = [0, 56], sizes = [16, 8], strides = [1, 1]} : vector<16x96xbf16> to vector<16x8xbf16>
    %58 = vector.extract_strided_slice %3 {offsets = [0, 88], sizes = [16, 8], strides = [1, 1]} : vector<16x96xbf16> to vector<16x8xbf16>
    "tpu.trace_start"() <{level = 10 : i32, message = "qd,kd->qk"}> : () -> ()
    %cst_17 = arith.constant dense<0.000000e+00> : vector<16x16xf32>
    %59 = tpu.matmul %56, %57, %cst_17 {dimension_numbers = #tpu.dot_dimension_numbers<[1], [1], [0], [0], [0, 0, 1, 0], [], []>} : vector<16x8xbf16>, vector<16x8xbf16>, vector<16x16xf32> -> vector<16x16xf32>
    "tpu.trace_stop"() : () -> ()
    %60 = arith.addf %59, %4 : vector<16x16xf32>
    %cst_18 = arith.constant dense<0xFF800000> : vector<16xf32>
    %61 = vector.multi_reduction <maximumf>, %60, %cst_18 [1] : vector<16x16xf32> to vector<16xf32>
    %62 = vector.shape_cast %61 : vector<16xf32> to vector<16x1xf32>
    %63 = vector.broadcast %62 : vector<16x1xf32> to vector<16x16xf32>
    %64 = arith.subf %60, %63 : vector<16x16xf32>
    %65 = math.exp %64 : vector<16x16xf32>
    %cst_19 = arith.constant dense<0.000000e+00> : vector<16xf32>
    %66 = vector.multi_reduction <add>, %65, %cst_19 [1] : vector<16x16xf32> to vector<16xf32>
    %67 = vector.shape_cast %66 : vector<16xf32> to vector<16x1xf32>
    %68 = arith.truncf %65 : vector<16x16xf32> to vector<16x16xbf16>
    %cst_20 = arith.constant dense<0.000000e+00> : vector<16x8xf32>
    %69 = tpu.matmul %68, %58, %cst_20 {dimension_numbers = #tpu.dot_dimension_numbers<[1], [0], [0], [1], [0, 0, 1, 1], [], []>} : vector<16x16xbf16>, vector<16x8xbf16>, vector<16x8xf32> -> vector<16x8xf32>
    %70 = tpu.reciprocal %67 {approx = true} : vector<16x1xf32> -> vector<16x1xf32>
    %71 = vector.broadcast %70 : vector<16x1xf32> to vector<16x8xf32>
    %72 = arith.mulf %69, %71 : vector<16x8xf32>
    %73 = tpu.concatenate %21, %38, %55, %72 in 1 : vector<16x8xf32>, vector<16x8xf32>, vector<16x8xf32>, vector<16x8xf32> -> vector<16x32xf32>
    %74 = arith.truncf %73 : vector<16x32xf32> to vector<16x32xbf16>
    %c0_21 = arith.constant 0 : index
    %c0_22 = arith.constant 0 : index
    %75 = vector.load %arg2[%c0_21, %c0_22] : memref<32x32xbf16, #tpu.memory_space<vmem>>, vector<32x32xbf16>
    %cst_23 = arith.constant dense<0.000000e+00> : vector<16x32xf32>
    %76 = tpu.matmul %74, %75, %cst_23 {dimension_numbers = #tpu.dot_dimension_numbers<[1], [0], [0], [1], [0, 0, 1, 1], [], []>} : vector<16x32xbf16>, vector<32x32xbf16>, vector<16x32xf32> -> vector<16x32xf32>
    %c0_24 = arith.constant 0 : index
    %c0_25 = arith.constant 0 : index
    %77 = vector.load %arg4[%c0_24, %c0_25] : memref<16x32xf32, #tpu.memory_space<vmem>>, vector<16x32xf32>
    tpu.vector_store %arg4[%c0_24, %c0_25], %76 {strides = array<i32>} : memref<16x32xf32, #tpu.memory_space<vmem>>, vector<16x32xf32>,
    return
  }
}

</mosaic_0001>

<bundles_post_ra>
// kernel: mha_forward.1
= control target key start
LH: loop header
LB: loop body
LE: loop exit
PB: predicated region body
PF: predicated region fallthrough
CT: control target
= control target key end

     0   :  { %9 = vsyncpa [#allocation3], 0  ;;  %s1115_s0 = inlined_call_operand.vmem [shape: bf16[16,32], index: 0, kind: input, shape index: {}]   ;;  %s1116_s1 = inlined_call_operand.vmem [shape: bf16[32,96], index: 1, kind: input, shape index: {}]   ;;  %s1117_s2 = inlined_call_operand.hbm [shape: bf16[32,32], index: 2, kind: input, shape index: {}]   ;;  %s1118_s3 = inlined_call_operand.hbm [shape: f32[16,16], index: 3, kind: input, shape index: {}]   ;;  %s1119_s4 = inlined_call_operand.hbm [shape: f32[16,32], index: 4, kind: output, shape index: {}]  }
   0x1   :  { %10 = vsyncpa [#allocation6], 0 }
   0x2   :  { %11 = vsyncpa [#allocation4], 0  ;;  %s955_s15 = smov [#allocation2]  }
   0x3   :  { %s21_s16 = sshll.u32 %s955_s15, 4  ;;  %s22_s16 = int_to_ptr.vmem [resolvable:$true] %s21_s16 }
   0x4   :  { %s897_s17 = scalar_lea.vmem %s22_s16, 256  ;;  %p902_p1 = scmp.lt.s32.totalorder %s22_s16, %s22_s16 }
   0x5   :  { %p898_p0 = scmp.ne.s32.totalorder %s22_s16, %s897_s17  ;;  %p903_p2 = scmp.lt.s32.totalorder %s897_s17, %s897_s17 }
   0x7   :  { %p904_p3 = por %p903_p2, %p902_p1 }
   0x9   :  { %p905_p4 = pnand %p904_p3, %p898_p0 }
   0xb   :  { %908 = shalt.err (!%p905_p4)
}
   0xc   :  { %s956_s18 = smov 64   ;;  %s957_s19 = smov 4  }
   0xd   :  { %27 = dma.hbm_to_vmem [thread:$0]  %s1117_s2, 256, %s22_s16, [#allocation3], %s956_s18, %s956_s18, %s957_s19  }
   0xe   :  { %s958_s22 = smov [#allocation5]  }
   0xf   :  { %s33_s23 = sshll.u32 %s958_s22, 4  ;;  %s34_s23 = int_to_ptr.vmem [resolvable:$true] %s33_s23 }
  0x10   :  { %s917_s24 = scalar_lea.vmem %s34_s23, 256  ;;  %p922_p6 = scmp.lt.s32.totalorder %s34_s23, %s34_s23 }
  0x11   :  { %p918_p5 = scmp.ne.s32.totalorder %s34_s23, %s917_s24  ;;  %p923_p7 = scmp.lt.s32.totalorder %s917_s24, %s917_s24 }
  0x13   :  { %p924_p8 = por %p923_p7, %p922_p6 }
  0x15   :  { %p925_p9 = pnand %p924_p8, %p918_p5 }
  0x17   :  { %928 = shalt.err (!%p925_p9)
}
  0x18   :  { %s959_s25 = smov 128   ;;  %s960_s26 = smov 8  }
  0x19   :  { %39 = dma.hbm_to_vmem [thread:$0]  %s1118_s3, 256, %s34_s23, [#allocation6], %s959_s25, %s959_s25, %s960_s26  }
  0x1a   :  { %949 = dma.done.wait [#allocation3], 256  }
  0x1b   :  { %950 = vsyncadd [#allocation3], 4294967040 }
  0x1c   :  { %951 = dma.done.wait [#allocation6], 256  }
  0x1d   :  { %952 = vsyncadd [#allocation6], 4294967040  ;;  %v961_v0 = vmov 0.0   ;;  %vm962_vm0 = vmmov 0   ;;  %v852_v1 = vld [vmem:[%s1116_s1 + $0x8] sm:$0xff]   ;;  %v853_v2 = vld [vmem:[%s1116_s1] sm:$0xff]  }
  0x1e   :  { %752 = vmatprep.subr.bf16.mxu0 %v961_v0  ;;  %756 = vmatprep.mubr.msk.bf16.mxu0 %vm962_vm0, %v961_v0  ;;  %v854_v3 = vld [vmem:[%s1115_s0] sm:$0xff]   ;;  %vm70_vm1 = vcmask 261120   ;;  %s963_s1 = smov 120   ;;  %s964_s7 = smov 96   ;;  %vm121_vm2 = vcmask 64512   ;;  %v116_v20 = vld [vmem:[#allocation5] sm:$0xff] }
  0x1f   :  { %760 = vmatprep.subr.bf16.mxu1 %v961_v0  ;;  %762 = vmatprep.mubr.msk.bf16.mxu1 %vm962_vm0, %v961_v0  ;;  %s965_s0 = smov 80   ;;  %s966_s8 = smov 88   ;;  %vm169_vm3 = vcmask 130048   ;;  %v117_v24 = vld [vmem:[#allocation5 + $0x8] sm:$0xff]  ;;  %vm631_vm4 = vcmask 195584  }
  0x20   :  { %753 = vmatpush3.bf16.msra.mxu0 %v852_v1  ;;  %s967_s9 = smov 72   ;;  %s968_s10 = smov 112  }
  0x21   :  { %754 = vmatprep.subr.bf16.mxu0 %v961_v0  ;;  %s969_s11 = smov 104   ;;  %s970_s12 = smov 56  }
  0x22   :  { %s971_s13 = smov 48   ;;  %s972_s14 = smov 40  }
  0x23   :  { %s973_s15 = smov 16   ;;  %s974_s16 = smov 24  }
  0x24   :  { %755 = vmatpush3.bf16.msra.mxu0 %v853_v2  ;;  %s975_s17 = smov [#allocation7]  }
  0x25   :  { %766 = vmatprep.subr.bf16.mxu0 %v961_v0 }
  0x27   :  { %757 = vmatmul.mubr.msk.bf16.vlgmr.msra.gmra.mxu0 %vm70_vm1, %v854_v3 }
  0x28   :  { %768 = vmatprep.mubr.msk.bf16.mxu0 %vm962_vm0, %v961_v0 }
  0xe7   :  { %v108_v4 = vpop.f32.mrf.mxu0 }
  0xe9   :  { %v758_v5 = vpop.f32.mrf.mxu0 }
  0xeb   :  { %v111_v6 = vpop.f32.mrf.mxu0 }
  0xec   :  { %v1032_v7 = vpack.c.bf16 %v111_v6, %v108_v4 }
  0xed   :  { %v759_v8 = vpop.f32.mrf.mxu0 }
  0xee   :  { %240 = vrot.lane.b32.xlu1 %v1032_v7, %s963_s1  ;;  %119 = vrot.lane.b32.xlu0 %v1032_v7, %s964_s7 }
  0xf2   :  { %363 = vrot.lane.b32.xlu1 %v1032_v7, %s965_s0  ;;  %242 = vrot.lane.b32.xlu0 %v1032_v7, %s966_s8 }
  0xf6   :  { %484 = vrot.lane.b32.xlu1 %v1032_v7, %s967_s9  ;;  %361 = vrot.lane.b32.xlu0 %v1032_v7, %s968_s10 }
  0xfa   :  { %482 = vrot.lane.b32.xlu0 %v1032_v7, %s969_s11 }
 0x160   :  { %v120_v9 = vpop.permute.xlu0 %119  ;;  %v241_v12 = vpop.permute.xlu1 %240 }
 0x161   :  { %v126_v10 = vsel %vm121_vm2, %v120_v9, 0 }
 0x162   :  { %761 = vmatpush3.bf16.xpose.msra.mxu1 %v126_v10 }
 0x163   :  { %772 = vmatprep.subr.bf16.mxu1 %v961_v0 }
 0x164   :  { %v243_v11 = vpop.permute.xlu0 %242  ;;  %v364_v14 = vpop.permute.xlu1 %363 }
 0x165   :  { %v248_v13 = vsel %vm121_vm2, %v243_v11, 0  ;;  %v369_v15 = vsel %vm121_vm2, %v364_v14, 0 }
 0x168   :  { %v485_v16 = vpop.permute.xlu1 %484  ;;  %v362_v17 = vpop.permute.xlu0 %361 }
 0x169   :  { %763 = vmatmul.mubr.msk.bf16.vlgmr.msra.gmra.mxu1 %vm121_vm2, %v1032_v7  ;;  %v490_v18 = vsel %vm121_vm2, %v485_v16, 0 }
 0x16a   :  { %773 = vmatpush3.bf16.xpose.msra.mxu1 %v248_v13  ;;  %774 = vmatprep.mubr.msk.bf16.mxu1 %vm962_vm0, %v961_v0 }
 0x16b   :  { %784 = vmatprep.subr.bf16.mxu1 %v961_v0 }
 0x16c   :  { %v483_v19 = vpop.permute.xlu0 %482 }
 0x171   :  { %775 = vmatmul.mubr.msk.bf16.vlgmr.msra.gmra.mxu1 %vm121_vm2, %v241_v12 }
 0x172   :  { %785 = vmatpush3.bf16.xpose.msra.mxu1 %v369_v15  ;;  %786 = vmatprep.mubr.msk.bf16.mxu1 %vm962_vm0, %v961_v0 }
 0x173   :  { %796 = vmatprep.subr.bf16.mxu1 %v961_v0 }
 0x179   :  { %787 = vmatmul.mubr.msk.bf16.vlgmr.msra.gmra.mxu1 %vm121_vm2, %v362_v17 }
 0x17a   :  { %797 = vmatpush3.bf16.xpose.msra.mxu1 %v490_v18  ;;  %798 = vmatprep.mubr.msk.bf16.mxu1 %vm962_vm0, %v961_v0 }
 0x17b   :  { %808 = vmatprep.subr.bf16.mxu1 %v961_v0 }
 0x181   :  { %799 = vmatmul.mubr.msk.bf16.vlgmr.msra.gmra.mxu1 %vm121_vm2, %v483_v19 }
 0x182   :  { %812 = vmatprep.mubr.msk.bf16.mxu1 %vm962_vm0, %v961_v0 }
 0x229   :  { %v162_v21 = vpop.f32.mrf.mxu1 }
 0x22a   :  { %v163_v22 = vadd.f32 %v162_v21, %v116_v20 }
 0x22b   :  { %v764_v23 = vpop.f32.mrf.mxu1 }
 0x22c   :  { %v170_v25 = vsel %vm169_vm3, %v163_v22, -inf }
 0x22d   :  { %171 = vmax.xlane.f32.xlu1 %v170_v25  ;;  %v165_v26 = vpop.f32.mrf.mxu1 }
 0x22e   :  { %v166_v27 = vadd.f32 %v165_v26, %v117_v24 }
 0x22f   :  { %v765_v28 = vpop.f32.mrf.mxu1 }
 0x230   :  { %v173_v29 = vsel %vm169_vm3, %v166_v27, -inf }
 0x231   :  { %174 = vmax.xlane.f32.xlu0 %v173_v29  ;;  %v284_v30 = vpop.f32.mrf.mxu1 }
 0x232   :  { %v285_v31 = vadd.f32 %v284_v30, %v116_v20 }
 0x233   :  { %v776_v32 = vpop.f32.mrf.mxu1 }
 0x234   :  { %v291_v33 = vsel %vm169_vm3, %v285_v31, -inf }
 0x235   :  { %292 = vmax.xlane.f32.xlu0 %v291_v33  ;;  %v287_v34 = vpop.f32.mrf.mxu1 }
 0x236   :  { %v288_v35 = vadd.f32 %v287_v34, %v117_v24 }
 0x237   :  { %v777_v36 = vpop.f32.mrf.mxu1 }
 0x238   :  { %v294_v37 = vsel %vm169_vm3, %v288_v35, -inf }
 0x239   :  { %295 = vmax.xlane.f32.xlu1 %v294_v37  ;;  %v405_v38 = vpop.f32.mrf.mxu1 }
 0x23a   :  { %v406_v39 = vadd.f32 %v405_v38, %v116_v20 }
 0x23b   :  { %v788_v40 = vpop.f32.mrf.mxu1 }
 0x23c   :  { %v412_v41 = vsel %vm169_vm3, %v406_v39, -inf }
 0x23d   :  { %413 = vmax.xlane.f32.xlu0 %v412_v41  ;;  %v408_v42 = vpop.f32.mrf.mxu1 }
 0x23e   :  { %v409_v48 = vadd.f32 %v408_v42, %v117_v24 }
 0x23f   :  { %v789_v43 = vpop.f32.mrf.mxu1 }
 0x240   :  { %v415_v51 = vsel %vm169_vm3, %v409_v48, -inf }
 0x241   :  { %v526_v44 = vpop.f32.mrf.mxu1 }
 0x242   :  { %v1070_v49 = vadd.f32 %v526_v44, %v116_v20 }
 0x243   :  { %v800_v45 = vpop.f32.mrf.mxu1 }
 0x244   :  { %v533_v52 = vsel %vm169_vm3, %v1070_v49, -inf }
 0x245   :  { %v529_v46 = vpop.f32.mrf.mxu1 }
 0x246   :  { %v530_v50 = vadd.f32 %v529_v46, %v117_v24 }
 0x247   :  { %v801_v47 = vpop.f32.mrf.mxu1 }
 0x248   :  { %v536_v53 = vsel %vm169_vm3, %v530_v50, -inf }
 0x24a   :  { %310 = vrot.lane.b32.xlu1 %v1032_v7, %s970_s12 }
 0x253   :  { %189 = vrot.lane.b32.xlu0 %v1032_v7, %s956_s18  ;;  %s702_s18 = sshll.u32 %s975_s17, 4  ;;  %s703_s18 = int_to_ptr.vmem [resolvable:$true] %s702_s18 }
 0x254   :  { %s929_s19 = scalar_lea.vmem %s703_s18, 256  ;;  %p934_p11 = scmp.lt.s32.totalorder %s703_s18, %s703_s18 }
 0x255   :  { %p930_p10 = scmp.ne.s32.totalorder %s703_s18, %s929_s19  ;;  %p935_p12 = scmp.lt.s32.totalorder %s929_s19, %s929_s19 }
 0x257   :  { %p936_p13 = por %p935_p12, %p934_p11 }
 0x259   :  { %p937_p0 = pnand %p936_p13, %p930_p10 }
 0x26e   :  { %416 = vmax.xlane.f32.xlu1 %v415_v51 }
 0x272   :  { %534 = vmax.xlane.f32.xlu0 %v533_v52  ;;  %537 = vmax.xlane.f32.xlu1 %v536_v53 }
 0x283   :  { %431 = vrot.lane.b32.xlu1 %v1032_v7, %s971_s13 }
 0x288   :  { %552 = vrot.lane.b32.xlu0 %v1032_v7, %s972_s14 }
 0x2b6   :  { %v172_v54 = vpop.xlane.xlu1 %171 }
 0x2b7   :  { %v176_v55 = vsub.f32 %v163_v22, %v172_v54 }
 0x2b9   :  { %v178_v56 = vmul.f32 1.442695, %v176_v55 }
 0x2ba   :  { %v175_v57 = vpop.xlane.xlu0 %174 }
 0x2bb   :  { %v177_v58 = vsub.f32 %v166_v27, %v175_v57  ;;  %857 = vpow2.f32 %v178_v56 }
 0x2bd   :  { %v180_v59 = vmul.f32 1.442695, %v177_v58  ;;  %v855_v58 = vld [vmem:[#allocation2 + $0x8] sm:$0xff]  }
 0x2be   :  { %v293_v60 = vpop.xlane.xlu0 %292  ;;  %809 = vmatpush3.bf16.msra.mxu1 %v855_v58 }
 0x2bf   :  { %859 = vpow2.f32 %v180_v59  ;;  %v297_v61 = vsub.f32 %v285_v31, %v293_v60  ;;  %810 = vmatprep.subr.bf16.mxu1 %v961_v0 }
 0x2c1   :  { %v299_v62 = vmul.f32 1.442695, %v297_v61 }
 0x2c2   :  { %v296_v63 = vpop.xlane.xlu1 %295 }
 0x2c3   :  { %861 = vpow2.f32 %v299_v62  ;;  %v298_v1 = vsub.f32 %v288_v35, %v296_v63 }
 0x2c5   :  { %v301_v2 = vmul.f32 1.442695, %v298_v1 }
 0x2c6   :  { %v414_v3 = vpop.xlane.xlu0 %413  ;;  %v311_v10 = vpop.permute.xlu1 %310 }
 0x2c7   :  { %863 = vpow2.f32 %v301_v2  ;;  %v418_v4 = vsub.f32 %v406_v39, %v414_v3  ;;  %v856_v3 = vld [vmem:[#allocation2] sm:$0xff]  }
 0x2c8   :  { %v858_v7 = vpop.eup %857  ;;  %811 = vmatpush3.bf16.msra.mxu1 %v856_v3 }
 0x2c9   :  { %v420_v5 = vmul.f32 1.442695, %v418_v4  ;;  %v182_v38 = vsel %vm169_vm3, %v858_v7, 0.0 }
 0x2ca   :  { %v190_v6 = vpop.permute.xlu0 %189 }
 0x2cb   :  { %865 = vpow2.f32 %v420_v5  ;;  %767 = vmatpush3.bf16.msra.mxu0 %v190_v6 }
 0x2cc   :  { %v860_v8 = vpop.eup %859  ;;  %778 = vmatprep.subr.bf16.mxu0 %v961_v0 }
 0x2cd   :  { %v188_v9 = vpack.c.bf16 %v860_v8, %v858_v7  ;;  %v185_v36 = vsel %vm169_vm3, %v860_v8, 0.0 }
 0x2cf   :  { %769 = vmatmul.mubr.msk.bf16.vlgmr.msra.gmra.mxu0 %vm169_vm3, %v188_v9 }
 0x2d0   :  { %v862_v11 = vpop.eup %861  ;;  %779 = vmatpush3.bf16.msra.mxu0 %v311_v10  ;;  %780 = vmatprep.mubr.msk.bf16.mxu0 %vm962_vm0, %v961_v0 }
 0x2d1   :  { %v303_v12 = vsel %vm169_vm3, %v862_v11, 0.0  ;;  %790 = vmatprep.subr.bf16.mxu0 %v961_v0 }
 0x2d2   :  { %304 = vadd.xlane.f32.xlu1 %v303_v12 }
 0x2d4   :  { %v864_v13 = vpop.eup %863 }
 0x2d5   :  { %v306_v14 = vsel %vm169_vm3, %v864_v13, 0.0  ;;  %v309_v15 = vpack.c.bf16 %v864_v13, %v862_v11 }
 0x2d6   :  { %307 = vadd.xlane.f32.xlu0 %v306_v14 }
 0x2d7   :  { %781 = vmatmul.mubr.msk.bf16.vlgmr.msra.gmra.mxu0 %vm169_vm3, %v309_v15 }
 0x2d8   :  { %v866_v16 = vpop.eup %865  ;;  %792 = vmatprep.mubr.msk.bf16.mxu0 %vm962_vm0, %v961_v0 }
 0x2d9   :  { %v424_v17 = vsel %vm169_vm3, %v866_v16, 0.0 }
 0x2da   :  { %425 = vadd.xlane.f32.xlu0 %v424_v17 }
 0x2f7   :  { %v417_v18 = vpop.xlane.xlu1 %416 }
 0x2f8   :  { %v419_v19 = vsub.f32 %v409_v48, %v417_v18 }
 0x2fa   :  { %v422_v20 = vmul.f32 1.442695, %v419_v19 }
 0x2fb   :  { %v538_v21 = vpop.xlane.xlu1 %537  ;;  %v535_v22 = vpop.xlane.xlu0 %534 }
 0x2fc   :  { %867 = vpow2.f32 %v422_v20  ;;  %v540_v23 = vsub.f32 %v530_v50, %v538_v21  ;;  %v539_v24 = vsub.f32 %v1070_v49, %v535_v22 }
 0x2fe   :  { %v543_v25 = vmul.f32 1.442695, %v540_v23  ;;  %v541_v26 = vmul.f32 1.442695, %v539_v24 }
 0x2ff   :  { %v432_v27 = vpop.permute.xlu1 %431  ;;  %v553_v31 = vpop.permute.xlu0 %552 }
 0x300   :  { %869 = vpow2.f32 %v543_v25  ;;  %791 = vmatpush3.bf16.msra.mxu0 %v432_v27 }
 0x301   :  { %871 = vpow2.f32 %v541_v26  ;;  %802 = vmatprep.subr.bf16.mxu0 %v961_v0 }
 0x309   :  { %v868_v28 = vpop.eup %867 }
 0x30a   :  { %v427_v29 = vsel %vm169_vm3, %v868_v28, 0.0  ;;  %v430_v30 = vpack.c.bf16 %v868_v28, %v866_v16 }
 0x30b   :  { %428 = vadd.xlane.f32.xlu1 %v427_v29 }
 0x30c   :  { %793 = vmatmul.mubr.msk.bf16.vlgmr.msra.gmra.mxu0 %vm169_vm3, %v430_v30 }
 0x30d   :  { %v870_v32 = vpop.eup %869  ;;  %803 = vmatpush3.bf16.msra.mxu0 %v553_v31  ;;  %804 = vmatprep.mubr.msk.bf16.mxu0 %vm962_vm0, %v961_v0 }
 0x30e   :  { %v872_v33 = vpop.eup %871  ;;  %v548_v34 = vsel %vm169_vm3, %v870_v32, 0.0 }
 0x30f   :  { %549 = vadd.xlane.f32.xlu1 %v548_v34  ;;  %v545_v35 = vsel %vm169_vm3, %v872_v33, 0.0  ;;  %v551_v37 = vpack.c.bf16 %v870_v32, %v872_v33 }
 0x310   :  { %546 = vadd.xlane.f32.xlu0 %v545_v35 }
 0x313   :  { %186 = vadd.xlane.f32.xlu1 %v185_v36 }
 0x314   :  { %183 = vadd.xlane.f32.xlu0 %v182_v38  ;;  %805 = vmatmul.mubr.msk.bf16.vlgmr.msra.gmra.mxu0 %vm169_vm3, %v551_v37 }
 0x35b   :  { %v305_v39 = vpop.xlane.xlu1 %304 }
 0x35c   :  { %873 = vrcp.f32 %v305_v39 }
 0x35f   :  { %v308_v40 = vpop.xlane.xlu0 %307 }
 0x360   :  { %875 = vrcp.f32 %v308_v40 }
 0x363   :  { %v426_v54 = vpop.xlane.xlu0 %425 }
 0x364   :  { %877 = vrcp.f32 %v426_v54 }
 0x369   :  { %v874_v47 = vpop.eup %873 }
 0x36d   :  { %v876_v48 = vpop.eup %875 }
 0x371   :  { %v878_v61 = vpop.eup %877 }
 0x38f   :  { %v229_v41 = vpop.f32.mrf.mxu0 }
 0x391   :  { %v770_v42 = vpop.f32.mrf.mxu0 }
 0x393   :  { %v232_v43 = vpop.f32.mrf.mxu0 }
 0x394   :  { %v429_v55 = vpop.xlane.xlu1 %428 }
 0x395   :  { %v771_v44 = vpop.f32.mrf.mxu0  ;;  %879 = vrcp.f32 %v429_v55 }
 0x397   :  { %v350_v45 = vpop.f32.mrf.mxu0 }
 0x398   :  { %v359_v50 = vmul.f32 %v874_v47, %v350_v45  ;;  %v550_v56 = vpop.xlane.xlu1 %549 }
 0x399   :  { %v782_v46 = vpop.f32.mrf.mxu0  ;;  %v547_v57 = vpop.xlane.xlu0 %546  ;;  %881 = vrcp.f32 %v550_v56 }
 0x39a   :  { %883 = vrcp.f32 %v547_v57 }
 0x39b   :  { %v353_v49 = vpop.f32.mrf.mxu0 }
 0x39c   :  { %v360_v51 = vmul.f32 %v876_v48, %v353_v49  ;;  %v187_v14 = vpop.xlane.xlu1 %186 }
 0x39d   :  { %v783_v52 = vpop.f32.mrf.mxu0  ;;  %v184_v15 = vpop.xlane.xlu0 %183  ;;  %885 = vrcp.f32 %v187_v14 }
 0x39e   :  { %v837_v53 = vpack.i.bf16 %v360_v51, %v359_v50  ;;  %887 = vrcp.f32 %v184_v15 }
 0x3a0   :  { %838 = vrot.lane.b32.xlu0 %v837_v53, %s960_s26 }
 0x3a2   :  { %v880_v62 = vpop.eup %879 }
 0x3a6   :  { %v882_v8 = vpop.eup %881 }
 0x3a7   :  { %v884_v9 = vpop.eup %883 }
 0x3aa   :  { %v886_v17 = vpop.eup %885 }
 0x3ab   :  { %v888_v19 = vpop.eup %887  ;;  %v239_v25 = vmul.f32 %v886_v17, %v232_v43 }
 0x3ac   :  { %v238_v24 = vmul.f32 %v888_v19, %v229_v41 }
 0x3cc   :  { %v471_v59 = vpop.f32.mrf.mxu0 }
 0x3cd   :  { %v480_v1 = vmul.f32 %v878_v61, %v471_v59 }
 0x3ce   :  { %v794_v60 = vpop.f32.mrf.mxu0 }
 0x3d0   :  { %v474_v63 = vpop.f32.mrf.mxu0 }
 0x3d1   :  { %v481_v2 = vmul.f32 %v880_v62, %v474_v63 }
 0x3d2   :  { %v795_v4 = vpop.f32.mrf.mxu0 }
 0x3d3   :  { %v842_v5 = vpack.i.bf16 %v481_v2, %v480_v1 }
 0x3d4   :  { %v592_v6 = vpop.f32.mrf.mxu0 }
 0x3d5   :  { %843 = vrot.lane.b32.xlu1 %v842_v5, %s973_s15  ;;  %v601_v11 = vmul.f32 %v884_v9, %v592_v6 }
 0x3d6   :  { %v806_v7 = vpop.f32.mrf.mxu0 }
 0x3d8   :  { %v595_v10 = vpop.f32.mrf.mxu0 }
 0x3d9   :  { %v602_v12 = vmul.f32 %v882_v8, %v595_v10 }
 0x3da   :  { %v807_v0 = vpop.f32.mrf.mxu0 }
 0x3db   :  { %v847_v13 = vpack.i.bf16 %v602_v12, %v601_v11 }
 0x3dd   :  { %848 = vrot.lane.b32.xlu1 %v847_v13, %s974_s16 }
 0x412   :  { %v839_v16 = vpop.permute.xlu0 %838 }
 0x413   :  { %v841_v20 = vunpack.i.h.bf16 %v839_v16  ;;  %v840_v21 = vunpack.i.l.bf16 %v839_v16 }
 0x415   :  { %v628_v27 = vsel %vm121_vm2, %v239_v25, %v841_v20  ;;  %v627_v28 = vsel %vm121_vm2, %v238_v24, %v840_v21 }
 0x447   :  { %v844_v18 = vpop.permute.xlu1 %843 }
 0x448   :  { %v846_v22 = vunpack.i.h.bf16 %v844_v18  ;;  %v845_v23 = vunpack.i.l.bf16 %v844_v18 }
 0x44a   :  { %v630_v31 = vsel %vm169_vm3, %v628_v27, %v846_v22  ;;  %v629_v32 = vsel %vm169_vm3, %v627_v28, %v845_v23 }
 0x44f   :  { %v849_v26 = vpop.permute.xlu1 %848 }
 0x450   :  { %v851_v29 = vunpack.i.h.bf16 %v849_v26  ;;  %v850_v30 = vunpack.i.l.bf16 %v849_v26 }
 0x452   :  { %v633_v33 = vsel %vm631_vm4, %v630_v31, %v851_v29  ;;  %v632_v34 = vsel %vm631_vm4, %v629_v32, %v850_v30 }
 0x453   :  { %v634_v35 = vpack.c.bf16 %v633_v33, %v632_v34 }
 0x455   :  { %813 = vmatmul.mubr.msk.bf16.vlgmr.msra.gmra.mxu1 %vm70_vm1, %v634_v35 }
 0x515   :  { %v688_v36 = vpop.f32.mrf.mxu1 }
 0x516   :  { %695 = vst.msk [vmem:[#allocation7] sm:$0xff] %vm70_vm1, %v688_v36 }
 0x517   :  { %v814_v37 = vpop.f32.mrf.mxu1 }
 0x519   :  { %v691_v38 = vpop.f32.mrf.mxu1 }
 0x51a   :  { %696 = vst.msk [vmem:[#allocation7 + $0x8] sm:$0xff] %vm70_vm1, %v691_v38 }
 0x51b   :  { %v815_v39 = vpop.f32.mrf.mxu1 }
 0x51c   :  { %940 = shalt.err (!%p937_p0)
}
 0x51d   :  { %708 = dma.vmem_to_hbm [thread:$0]  %s703_s18, 256, %s1119_s4, [#allocation4], %s959_s25, %s959_s25, %s960_s26  }
 0x51e   :  { %953 = dma.done.wait [#allocation4], 256  }
 0x51f   :  { %954 = vsyncadd [#allocation4], 4294967040 }
 0x520   :  { %712 = vsyncpa [#allocation3], 1 }
 0x521   :  { %713 = vsyncpa [#allocation6], 1 }
 0x522   :  { %714 = vsyncpa [#allocation4], 1 }

</bundles_post_ra>
